<compile_context>
chip_gen: v7x
topology: tpu7x:2x2x1
jax: 0.10.0
libtpu: 0.0.40
codegen_flags: <defaults>
</compile_context>

<pallas_src>
import functools

import jax
import jax.numpy as jnp
from jax.experimental import pallas as pl
from jax.experimental.pallas import tpu as pltpu


def _avg_readout_kernel(x_ref, o_ref, *scratch_refs, inv_n, n_total, tn):
    # x_ref: (BB, tn, D) input tile
    # o_ref: (1, BB, D)  output tile, resident across the N grid axis
    # scratch_refs: optional (1, BB, D) f32 accumulator (non-f32 outputs)
    acc_ref = scratch_refs[0] if scratch_refs else o_ref
    k = pl.program_id(1)

    @pl.when(k == 0)
    def _init():
        acc_ref[...] = jnp.zeros_like(acc_ref)

    x = x_ref[...].astype(jnp.float32)  # widen only for the reduce/add
    if n_total % tn != 0:
        # Last N tile is partial: out-of-bounds rows are NOT zero-filled on
        # TPU, so mask them before summing.
        row = jax.lax.broadcasted_iota(jnp.int32, x.shape, 1)
        x = jnp.where(row < (n_total - k * tn), x, 0.0)

    acc_ref[...] += jnp.sum(x, axis=1)[None, :, :]

    @pl.when(k == pl.num_programs(1) - 1)
    def _finalize():
        # Single multiply by the compile-time constant 1/N (original N).
        o_ref[...] = (acc_ref[...] * inv_n).astype(o_ref.dtype)


def avg_readout(seq, *, block_b=8, target_block_bytes=8 * 1024 * 1024,
                vmem_limit_bytes=48 * 1024 * 1024):
    """Mean over axis 1 of a (B, N, D) array via a streaming Pallas TPU kernel."""
    B, N, D = seq.shape
    orig_dtype = seq.dtype
    # torch.mean is defined for floating dtypes; keep float dtypes, promote the
    # rest to float32 for the output.
    out_dtype = orig_dtype if jnp.issubdtype(orig_dtype, jnp.floating) else jnp.float32
    in_itemsize = jnp.dtype(orig_dtype).itemsize
    out_itemsize = jnp.dtype(out_dtype).itemsize

    # Batch rows per grid step.  BB is a *leading* dim of the 3-D input block
    # (no (8,128) constraint).  Shrink it when B is small so the "parallel"
    # axis has >=2 blocks (both v7x TensorCores get work).
    BB = min(block_b, B)
    if pl.cdiv(B, BB) < 2 and B >= 2:
        BB = pl.cdiv(B, 2)
    grid_b = pl.cdiv(B, BB)

    # N tile: aim for ~target_block_bytes per input block, rounded to the
    # packed-sublane multiple for the dtype; a full-N tile is always legal.
    sub = max(8, 32 // in_itemsize)  # 8 for f32, 16 for bf16, 32 for int8/fp8
    tn = target_block_bytes // max(1, BB * D * in_itemsize)
    tn = max(sub, (tn // sub) * sub)
    if tn >= N:
        tn = N
    grid_n = pl.cdiv(N, tn)

    # f32 output can accumulate directly in the resident output block.
    use_scratch = jnp.dtype(out_dtype) != jnp.dtype(jnp.float32)
    scratch_shapes = [pltpu.VMEM((1, BB, D), jnp.float32)] if use_scratch else []

    kernel = functools.partial(_avg_readout_kernel, inv_n=1.0 / N, n_total=N, tn=tn)

    out = pl.pallas_call(
        kernel,
        out_shape=jax.ShapeDtypeStruct((grid_b, BB, D), out_dtype),
        grid_spec=pltpu.PrefetchScalarGridSpec(
            num_scalar_prefetch=0,
            grid=(grid_b, grid_n),
            in_specs=[pl.BlockSpec((BB, tn, D), lambda b, k: (b, k, 0))],
            out_specs=pl.BlockSpec((1, BB, D), lambda b, k: (b, 0, 0)),
            scratch_shapes=scratch_shapes,
        ),
        compiler_params=pltpu.CompilerParams(
            dimension_semantics=("parallel", "arbitrary"),
            vmem_limit_bytes=vmem_limit_bytes,
        ),
        cost_estimate=pl.CostEstimate(
            flops=int(B) * int(N) * int(D),
            transcendentals=0,
            bytes_accessed=int(B) * int(N) * int(D) * in_itemsize
            + int(B) * int(D) * out_itemsize,
        ),
    )(seq)

    # Drop the (tiny) over-allocated batch rows, if any.
    return out.reshape(grid_b * BB, D)[:B]


if __name__ == "__main__":
    key = jax.random.PRNGKey(0)

    # Shapes implied by the module: (batch, nodes, hidden) = (2, 8, 32).
    B, N, D = 2, 8, 32
    seq = jax.random.normal(key, (B, N, D), dtype=jnp.float32)

    out = avg_readout(seq)
    out = jax.block_until_ready(out)

    ref = jnp.mean(seq, axis=1)
    assert out.shape == (B, D)
    assert jnp.allclose(out, ref, atol=1e-5, rtol=1e-5)

    # Exercise the ragged path (partial batch block + masked N-remainder tile)
    # by forcing a tiny per-step block.
    B2, N2, D2 = 5, 23, 32
    seq2 = jax.random.normal(jax.random.PRNGKey(1), (B2, N2, D2), dtype=jnp.float32)
    out2 = jax.block_until_ready(avg_readout(seq2, target_block_bytes=2048))
    ref2 = jnp.mean(seq2, axis=1)
    assert out2.shape == (B2, D2)
    assert jnp.allclose(out2, ref2, atol=1e-5, rtol=1e-5)

    print("KERNEL_OK")
</pallas_src>

<mosaic_0001>
module attributes {stable_mosaic.version = 11 : i64} {
  func.func @_avg_readout_kernel(%arg0: i32, %arg1: i32, %arg2: memref<1x8x32xf32, #tpu.memory_space<vmem>>, %arg3: memref<1x1x32xf32, #tpu.memory_space<vmem>>) attributes {dimension_semantics = [#tpu.dimension_semantics<parallel>, #tpu.dimension_semantics<arbitrary>], iteration_bounds = array<i64: 2, 1>, scalar_prefetch = 0 : i64, scratch_operands = 0 : i64, tpu.core_type = #tpu.core_type<tc>, window_params = [{transform_indices = @transform_0, window_bounds = array<i64: 1, 8, 32>}, {transform_indices = @transform_1, window_bounds = array<i64: 1, 1, 32>}]} {
    %c0_i32 = arith.constant 0 : i32
    %0 = arith.cmpi eq, %arg1, %c0_i32 : i32
    %1 = arith.extui %0 : i1 to i32
    %c0_i32_0 = arith.constant 0 : i32
    %2 = arith.cmpi ne, %1, %c0_i32_0 : i32
    scf.if %2 {
      %cst_11 = arith.constant 0.000000e+00 : f32
      %12 = vector.broadcast %cst_11 : f32 to vector<1x1x32xf32>
      %c0_12 = arith.constant 0 : index
      %c0_13 = arith.constant 0 : index
      %c0_14 = arith.constant 0 : index
      %13 = vector.load %arg3[%c0_12, %c0_13, %c0_14] : memref<1x1x32xf32, #tpu.memory_space<vmem>>, vector<1x1x32xf32>
      tpu.vector_store %arg3[%c0_12, %c0_13, %c0_14], %12 {strides = array<i32>} : memref<1x1x32xf32, #tpu.memory_space<vmem>>, vector<1x1x32xf32>,
    } else {
    }
    %c0 = arith.constant 0 : index
    %c0_1 = arith.constant 0 : index
    %c0_2 = arith.constant 0 : index
    %3 = vector.load %arg2[%c0, %c0_1, %c0_2] : memref<1x8x32xf32, #tpu.memory_space<vmem>>, vector<1x8x32xf32>
    %c0_3 = arith.constant 0 : index
    %c0_4 = arith.constant 0 : index
    %c0_5 = arith.constant 0 : index
    %4 = vector.load %arg3[%c0_3, %c0_4, %c0_5] : memref<1x1x32xf32, #tpu.memory_space<vmem>>, vector<1x1x32xf32>
    %cst = arith.constant dense<0.000000e+00> : vector<1x32xf32>
    %5 = vector.multi_reduction <add>, %3, %cst [1] : vector<1x8x32xf32> to vector<1x32xf32>
    %6 = vector.shape_cast %5 : vector<1x32xf32> to vector<1x1x32xf32>
    %7 = arith.addf %4, %6 : vector<1x1x32xf32>
    %c0_6 = arith.constant 0 : index
    %c0_7 = arith.constant 0 : index
    %c0_8 = arith.constant 0 : index
    %8 = vector.load %arg3[%c0_6, %c0_7, %c0_8] : memref<1x1x32xf32, #tpu.memory_space<vmem>>, vector<1x1x32xf32>
    tpu.vector_store %arg3[%c0_6, %c0_7, %c0_8], %7 {strides = array<i32>} : memref<1x1x32xf32, #tpu.memory_space<vmem>>, vector<1x1x32xf32>,
    %c0_i32_9 = arith.constant 0 : i32
    %9 = arith.cmpi eq, %arg1, %c0_i32_9 : i32
    %10 = arith.extui %9 : i1 to i32
    %c0_i32_10 = arith.constant 0 : i32
    %11 = arith.cmpi ne, %10, %c0_i32_10 : i32
    scf.if %11 {
      %c0_11 = arith.constant 0 : index
      %c0_12 = arith.constant 0 : index
      %c0_13 = arith.constant 0 : index
      %12 = vector.load %arg3[%c0_11, %c0_12, %c0_13] : memref<1x1x32xf32, #tpu.memory_space<vmem>>, vector<1x1x32xf32>
      %cst_14 = arith.constant 1.250000e-01 : f32
      %13 = vector.broadcast %cst_14 : f32 to vector<1x1x32xf32>
      %14 = arith.mulf %12, %13 : vector<1x1x32xf32>
      %c0_15 = arith.constant 0 : index
      %c0_16 = arith.constant 0 : index
      %c0_17 = arith.constant 0 : index
      %15 = vector.load %arg3[%c0_15, %c0_16, %c0_17] : memref<1x1x32xf32, #tpu.memory_space<vmem>>, vector<1x1x32xf32>
      tpu.vector_store %arg3[%c0_15, %c0_16, %c0_17], %14 {strides = array<i32>} : memref<1x1x32xf32, #tpu.memory_space<vmem>>, vector<1x1x32xf32>,
    } else {
    }
    return
  }
  func.func @transform_0(%arg0: i32, %arg1: i32) -> (i32, i32, i32) {
    %c0_i32 = arith.constant 0 : i32
    %c0_i32_0 = arith.constant 0 : i32
    return %arg0, %arg1, %c0_i32 : i32, i32, i32
  }
  func.func @transform_1(%arg0: i32, %arg1: i32) -> (i32, i32, i32) {
    %c0_i32 = arith.constant 0 : i32
    %c0_i32_0 = arith.constant 0 : i32
    %c0_i32_1 = arith.constant 0 : i32
    return %arg0, %c0_i32, %c0_i32_0 : i32, i32, i32
  }
}

</mosaic_0001>

<bundles_post_ra>
// kernel: tpu_custom_call.1
= control target key start
LH: loop header
LB: loop body
LE: loop exit
PB: predicated region body
PF: predicated region fallthrough
CT: control target
= control target key end

     0   :  { %6 = vsyncpa [#allocation3], 0  ;;  %s636_s0 = inlined_call_operand.hbm [shape: f32[2,8,32], index: 0, kind: input, shape index: {}]   ;;  %s637_s1 = inlined_call_operand.hbm [shape: f32[2,1,32], index: 1, kind: output, shape index: {}]  }
   0x1   :  { %8 = vsyncpa [#allocation3 + $0x1], 0 }
   0x2   :  { %9 = vsyncpa [#allocation4], 0 }
   0x3   :  { %11 = vsyncpa [#allocation4 + $0x1], 0  ;;  %s460_s6 = smov 0   ;;  %s462_s7 = smov 0  }
   0x4   :  { %s464_s8 = smov 0   ;;  %s466_s9 = smov 0  }
   0x5   :  { %s468_s10 = smov 0   ;;  %s470_s11 = smov 0  }
   0x6 LB: > { %s259_s12 = sadd.s32 4294967295, %s445_s11   ;;  %s260_s13 = sadd.s32 4294967294, %s445_s11   ;;  %s445_s11 = sphi %s470_s11, %s17_s11   ;;  %s441_s10 = sphi %s468_s10, %s653_s10   ;;  %s437_s9 = sphi %s466_s9, %s652_s9   ;;  %s433_s8 = sphi %s464_s8, %s651_s8   ;;  %s429_s7 = sphi %s462_s7, %s650_s7   ;;  %s425_s6 = sphi %s460_s6, %s649_s6  }
   0x7   : > { %s29_s14 = sadd.s32 1, %s441_s10  ;;  %s38_s15 = sadd.s32 1, %s433_s8 }
   0x8   : > { %p31_p0 = scmp.ge.s32.totalorder %s29_s14, 2  ;;  %p45_p1 = scmp.ne.s32.totalorder %s433_s8, %s429_s7 }
   0x9   : > { %p46_p2 = scmp.eq.s32.totalorder %s445_s11, 0  ;;  %p51_p3 = scmp.ne.s32.totalorder %s429_s7, %s425_s6 }
   0xa   : > { %s655_s14 = smov (%p31_p0, %s29_s14), 0  ;;  %p52_p5 = scmp.eq.s32.totalorder %s259_s12, 0 }
   0xb   : > { %p501_p4 = por %p46_p2, %p45_p1  ;;  %s33_s17 = ssub.s32 %s441_s10, %s655_s14 }
   0xc   : > { %p75_p6 = scmp.eq.s32.totalorder %s259_s12, 1  ;;  %p36_p7 = scmp.eq.s32.totalorder %s33_s17, 0 }
   0xd   : > { %p507_p8 = por %p52_p5, %p51_p3  ;;  %p81_p10 = scmp.eq.s32.totalorder %s260_s13, 1 }
   0xe   : > { %p511_p9 = por %p75_p6, %p45_p1  ;;  %p282_p13 = scmp.lt.s32.totalorder %s445_s11, 2 }
   0xf   : > { %s516_s20 = scalar_select %p36_p7, %s433_s8, %s38_s15  }
  0x10   : > { %s641_s19 = scalar_select %p511_p9, 1, 0 }
  0x11   : > { %p518_p11 = por %p81_p10, %p51_p3  ;;  %s101_s22 = sand.u32 1, %s433_s8  }
  0x12   : > { %s263_s23 = sshll.u32 %s101_s22, 3  ;;  %s264_s24 = sshll.u32 %s441_s10, 7 }
  0x13   : > { %s642_s21 = scalar_select %p518_p11, 1, 0 }
  0x14   : > { %s529_s27 = scalar_lea.hbm %s636_s0, %s264_s24  ;;  %s105_s28 = scalar_lea.vmem [#allocation2], %s263_s23 }
  0x15   : > { %s113_s29 = sshll.u32 %s105_s28, 4  ;;  %p535_p0 = pnand %p282_p13, %p501_p4  ;;  %s531_s29 = int_to_ptr.vmem [resolvable:$true] %s113_s29 }
  0x16   : > { %s102_s2 = scalar_lea.sflag [#allocation3], %s101_s22  ;;  %s333_s3 = scalar_lea.hbm %s529_s27, 128 }
  0x17   : > { %p334_p3 = scmp.ne.s32.totalorder %s529_s27, %s333_s3  ;;  %p335_p5 = pneg %p535_p0 }
  0x18   : > { %s338_s12 = scalar_lea.hbm %s636_s0, 256  ;;  %p339_p4 = scmp.lt.u32.totalorder %s529_s27, %s636_s0 }
  0x19   : > { %p336_p6 = pnand %p335_p5, %p334_p3  ;;  %p340_p10 = scmp.lt.u32.totalorder %s338_s12, %s333_s3 }
  0x1a   : > { %p342_p12 = scmp.lt.u32.totalorder %s333_s3, %s529_s27 }
  0x1b   : > { %p337_p7 = pneg %p336_p6  ;;  %p341_p13 = por %p340_p10, %p339_p4 }
  0x1d   : > { %p343_p1 = por %p342_p12, %p341_p13 }
  0x1f   : > { %p344_p2 = pnand %p343_p1, %p337_p7 }
  0x21   : > { %347 = shalt.err (!%p344_p2)
}
  0x22   : > { %s348_s16 = scalar_lea.vmem %s531_s29, 128  ;;  %s447_s17 = smov [#allocation2]  }
  0x23   : > { %p349_p3 = scmp.ne.s32.totalorder %s531_s29, %s348_s16  ;;  %s353_s22 = sshll.u32 %s447_s17, 4  ;;  %s354_s22 = int_to_ptr.vmem [resolvable:$false] %s353_s22 }
  0x24   : > { %s355_s23 = scalar_lea.vmem %s354_s22, 256  ;;  %p356_p9 = scmp.lt.s32.totalorder %s531_s29, %s354_s22 }
  0x25   : > { %p351_p6 = pnand %p349_p3, %p335_p5  ;;  %p357_p4 = scmp.lt.s32.totalorder %s355_s23, %s348_s16 }
  0x27   : > { %p352_p11 = pneg %p351_p6  ;;  %p358_p10 = por %p357_p4, %p356_p9 }
  0x29   : > { %p359_p12 = pnand %p358_p10, %p352_p11 }
  0x2b   : > { %362 = shalt.err (!%p359_p12)
}
  0x2c   : > { %277 = dma.hbm_to_vmem [thread:$0]  (!%p535_p0), %s529_s27, 128, %s531_s29, %s102_s2  }
  0x2d   : > { %p644_p1 = scmp.lt.s32.totalorder %s445_s11, 3  ;;  %p645_p2 = scmp.ge.s32.totalorder %s445_s11, 1 }
  0x2f   : > { %p119_p5 = pnand %p645_p2, %p644_p1 }
  0x30   : > { %s571_s24 = sand.u32 (!%p119_p5), 1, %s429_s7  }
  0x31   : > { %122 = sbr.rel (%p119_p5) target bundleno = 97 (0x61), region = 24  ;;  %s266_s25 = sshll.u32 (!%p119_p5), %s571_s24, 3 }
  0x32   : > { %s125_s26 = scalar_lea.sflag (!%p119_p5), [#allocation3], %s571_s24  ;;  %s128_s28 = scalar_lea.vmem (!%p119_p5), [#allocation2], %s266_s25 }
  0x38   : > { %416 = dma.done.wait (%p507_p8), %s125_s26, 128  }
  0x39   : > { %418 = vsyncadd (%p507_p8), %s125_s26, 4294967168  ;;  %vm150_vm0 = vcmask 253952   ;;  %s145_s27 = scalar_lea.vmem [#allocation5], %s571_s24  ;;  %v448_v0 = vmov 0.0   ;;  %vm154_vm1 = vcmask 261120   ;;  %v152_v1 = vld [vmem:[%s128_s28] sm:$0xff] }
  0x3a   : > { %151 = vst.msk [vmem:[%s145_s27] sm:$0x1] %vm150_vm0, %v448_v0  ;;  %v155_v2 = vsel %vm154_vm1, %v152_v1, 0.0  ;;  %s267_s18 = sshll.u32 %s437_s9, 4  ;;  %s184_s29 = sshll.u32 %s145_s27, 4  ;;  %s588_s29 = int_to_ptr.vmem [resolvable:$true] %s184_s29 }
  0x3b   : > { %v156_v3 = vrot.slane %v155_v2, 4  ;;  %s586_s3 = scalar_lea.hbm %s637_s1, %s267_s18  ;;  %s172_s4 = scalar_lea.sflag [#allocation4], %s571_s24 }
  0x3c   : > { %s363_s5 = scalar_lea.vmem %s588_s29, 16  ;;  %p646_p9 = scmp.ne.s32.totalorder %s641_s19, 0 }
  0x3d   : > { %v157_v4 = vadd.f32 %v156_v3, %v155_v2  ;;  %p364_p8 = scmp.ne.s32.totalorder %s588_s29, %s363_s5  ;;  %s449_s9 = smov [#allocation5]  }
  0x3e   : > { %s367_s12 = sshll.u32 %s449_s9, 4  ;;  %s368_s12 = int_to_ptr.vmem [resolvable:$false] %s367_s12 }
  0x3f   : > { %v158_v5 = vrot.slane %v157_v4, 2  ;;  %p365_p11 = pnand %p364_p8, %p646_p9  ;;  %s369_s13 = scalar_lea.vmem %s368_s12, 32 }
  0x40   : > { %p370_p7 = scmp.lt.s32.totalorder %s588_s29, %s368_s12  ;;  %p371_p13 = scmp.lt.s32.totalorder %s369_s13, %s363_s5 }
  0x41   : > { %v159_v6 = vadd.f32 %v158_v5, %v157_v4  ;;  %v153_v8 = vld [vmem:[%s145_s27] sm:$0x1]  ;;  %p366_p0 = pneg %p365_p11 }
  0x42   : > { %p372_p3 = por %p371_p13, %p370_p7 }
  0x43   : > { %v160_v7 = vrot.slane %v159_v6, 1 }
  0x44   : > { %p373_p6 = pnand %p372_p3, %p366_p0 }
  0x45   : > { %v161_v9 = vadd.f32 %v160_v7, %v159_v6 }
  0x47   : > { %v162_v10 = vadd.f32 %v161_v9, %v153_v8 }
  0x49   : > { %164 = vst.msk [vmem:[%s145_s27] sm:$0x1] %vm150_vm0, %v162_v10 }
  0x50   : > { %v168_v11 = vld [vmem:[%s145_s27] sm:$0x1] }
  0x51   : > { %v169_v12 = vmul.f32 0.125, %v168_v11 }
  0x53   : > { %170 = vst.msk [vmem:[%s145_s27] sm:$0x1] %vm150_vm0, %v169_v12 }
  0x54   : > { %376 = shalt.err (!%p373_p6)
}
  0x55   : > { %s377_s15 = scalar_lea.hbm %s586_s3, 16  ;;  %s381_s22 = scalar_lea.hbm %s637_s1, 32 }
  0x56   : > { %p378_p4 = scmp.ne.s32.totalorder %s586_s3, %s377_s15  ;;  %p382_p1 = scmp.lt.u32.totalorder %s586_s3, %s637_s1 }
  0x57   : > { %p383_p2 = scmp.lt.u32.totalorder %s381_s22, %s377_s15  ;;  %p385_p8 = scmp.lt.u32.totalorder %s377_s15, %s586_s3 }
  0x58   : > { %p379_p10 = pnand %p378_p4, %p646_p9 }
  0x59   : > { %p384_p5 = por %p383_p2, %p382_p1 }
  0x5a   : > { %p380_p12 = pneg %p379_p10 }
  0x5b   : > { %p386_p11 = por %p385_p8, %p384_p5 }
  0x5d   : > { %p387_p0 = pnand %p386_p11, %p380_p12 }
  0x5f   : > { %390 = shalt.err (!%p387_p0)
}
  0x60   : > { %272 = dma.vmem_to_hbm [thread:$0]  (%p646_p9), %s588_s29, 16, %s586_s3, %s172_s4  }
  0x61 PF: > { %s196_s25 = sand.u32 1, %s425_s6   ;;  %p647_p7 = scmp.ne.s32.totalorder %s642_s21, 0 }
  0x62   : > { %p648_p13 = scmp.ge.s32.totalorder %s445_s11, 2  ;;  %s197_s26 = scalar_lea.sflag [#allocation4], %s196_s25 }
  0x64   : > { %p279_p3 = pnand %p648_p13, %p647_p7 }
  0x66   : > { %420 = dma.done.wait (!%p279_p3), %s197_s26, 16  }
  0x67   : > { %422 = vsyncadd (!%p279_p3), %s197_s26, 4294967280  ;;  %s17_s11 = sadd.s32 1, %s445_s11   ;;  %s649_s6 = smov %s429_s7 }
  0x68   : > { %p14_p6 = scmp.ge.s32.totalorder %s17_s11, 4   ;;  %s650_s7 = smov %s433_s8 }
  0x69   : > { %s651_s8 = smov %s516_s20  ;;  %s652_s9 = smov %s441_s10 }
  0x6a   : > { %s653_s10 = smov %s655_s14  ;;  %16 = sbr.rel (!%p14_p6) target bundleno = 6 (0x6), region = 77 }
  0x71   :  { %201 = vsyncpa [#allocation3], 1 }
  0x72   :  { %203 = vsyncpa [#allocation3 + $0x1], 1 }
  0x73   :  { %204 = vsyncpa [#allocation4], 1 }
  0x74   :  { %206 = vsyncpa [#allocation4 + $0x1], 1 }

</bundles_post_ra>
